<compile_context>
chip_gen: v5e
topology: v5e:2x2
jax: 0.10.0
libtpu: 0.0.40
codegen_flags: <defaults>
</compile_context>

<pallas_src>
import jax
import jax.numpy as jnp
from jax import lax
from jax.experimental import pallas as pl
from jax.experimental.pallas import tpu as pltpu  # noqa: F401  (kept for TPU-specific extensions)

EPS = 1e-5
LANE = 128


def _bn_kernel(x_ref, gamma_ref, beta_ref, o_ref):
    # x_ref:     (L, Cp)  float32   (channels in lanes, rows = N*H*W)
    # gamma_ref: (1, Cp)  float32
    # beta_ref:  (1, Cp)  float32
    x = x_ref[...]
    n_rows = x.shape[0]
    inv_n = jnp.float32(1.0 / n_rows)

    # One-pass per-channel batch statistics (reduction over sublanes -> VPU).
    s = jnp.sum(x, axis=0, keepdims=True)        # (1, Cp)
    s2 = jnp.sum(x * x, axis=0, keepdims=True)   # (1, Cp)
    mean = s * inv_n
    var = s2 * inv_n - mean * mean               # biased variance (torch training norm)
    inv_std = lax.rsqrt(var + EPS)

    # Fold affine into a single per-channel scale + shift.
    a = gamma_ref[...] * inv_std                 # (1, Cp)
    b = beta_ref[...] - mean * a                 # (1, Cp)

    # Dominant elementwise pass: 2 ops / element, lane-dense store.
    o_ref[...] = x * a + b


def batchnorm2d_pallas(x_nchw, gamma, beta):
    """x_nchw: (N, C, H, W) float32; gamma/beta: (C,) float32."""
    N, C, H, W = x_nchw.shape
    L = N * H * W
    Cp = ((C + LANE - 1) // LANE) * LANE

    # Glue: channel-last slab (L, C), pad channels to a full lane tile.
    x2d = jnp.transpose(x_nchw, (0, 2, 3, 1)).reshape(L, C).astype(jnp.float32)
    if Cp != C:
        x2d = jnp.pad(x2d, ((0, 0), (0, Cp - C)))
    g = jnp.pad(gamma.astype(jnp.float32), (0, Cp - C)).reshape(1, Cp)
    b = jnp.pad(beta.astype(jnp.float32), (0, Cp - C)).reshape(1, Cp)

    out2d = pl.pallas_call(
        _bn_kernel,
        out_shape=jax.ShapeDtypeStruct((L, Cp), jnp.float32),
        in_specs=[
            pl.BlockSpec((L, Cp), lambda: (0, 0)),
            pl.BlockSpec((1, Cp), lambda: (0, 0)),
            pl.BlockSpec((1, Cp), lambda: (0, 0)),
        ],
        out_specs=pl.BlockSpec((L, Cp), lambda: (0, 0)),
    )(x2d, g, b)

    # Glue: drop channel padding, back to NCHW.
    out = out2d[:, :C].reshape(N, H, W, C)
    return jnp.transpose(out, (0, 3, 1, 2))
    # TODO(synk): training-mode running_mean/running_var buffer updates are not
    # produced (forward output only, matching the requested forward semantics).


def batchnorm2d_ref(x_nchw, gamma, beta):
    mean = jnp.mean(x_nchw, axis=(0, 2, 3), keepdims=True)
    var = jnp.mean((x_nchw - mean) ** 2, axis=(0, 2, 3), keepdims=True)
    g = gamma.reshape(1, -1, 1, 1)
    b = beta.reshape(1, -1, 1, 1)
    return (x_nchw - mean) * lax.rsqrt(var + EPS) * g + b


if __name__ == "__main__":
    key = jax.random.PRNGKey(0)
    kx, kg, kb = jax.random.split(key, 3)

    # Shapes implied by the module: (1, 122, 28, 28)
    N, C, H, W = 1, 122, 28, 28
    x = jax.random.normal(kx, (N, C, H, W), dtype=jnp.float32)
    gamma = 1.0 + 0.1 * jax.random.normal(kg, (C,), dtype=jnp.float32)
    beta = 0.1 * jax.random.normal(kb, (C,), dtype=jnp.float32)

    out = batchnorm2d_pallas(x, gamma, beta)
    out = jax.block_until_ready(out)

    ref = batchnorm2d_ref(x, gamma, beta)
    assert out.shape == (N, C, H, W)
    assert jnp.allclose(out, ref, atol=1e-4, rtol=1e-4)

    print("KERNEL_OK")
</pallas_src>

<mosaic_0001>
module attributes {stable_mosaic.version = 11 : i64} {
  func.func @_bn_kernel(%arg0: memref<784x128xf32, #tpu.memory_space<vmem>>, %arg1: memref<1x128xf32, #tpu.memory_space<vmem>>, %arg2: memref<1x128xf32, #tpu.memory_space<vmem>>, %arg3: memref<784x128xf32, #tpu.memory_space<vmem>>) attributes {dimension_semantics = [], scalar_prefetch = 0 : i64, scratch_operands = 0 : i64, tpu.core_type = #tpu.core_type<tc>} {
    %c0 = arith.constant 0 : index
    %c0_0 = arith.constant 0 : index
    %0 = vector.load %arg0[%c0, %c0_0] : memref<784x128xf32, #tpu.memory_space<vmem>>, vector<784x128xf32>
    %cst = arith.constant dense<0.000000e+00> : vector<128xf32>
    %1 = vector.multi_reduction <add>, %0, %cst [0] : vector<784x128xf32> to vector<128xf32>
    %2 = vector.shape_cast %1 : vector<128xf32> to vector<1x128xf32>
    %3 = arith.mulf %0, %0 : vector<784x128xf32>
    %cst_1 = arith.constant dense<0.000000e+00> : vector<128xf32>
    %4 = vector.multi_reduction <add>, %3, %cst_1 [0] : vector<784x128xf32> to vector<128xf32>
    %5 = vector.shape_cast %4 : vector<128xf32> to vector<1x128xf32>
    %cst_2 = arith.constant 0.00127551018 : f32
    %6 = vector.broadcast %cst_2 : f32 to vector<1x128xf32>
    %7 = arith.mulf %2, %6 : vector<1x128xf32>
    %cst_3 = arith.constant 0.00127551018 : f32
    %8 = vector.broadcast %cst_3 : f32 to vector<1x128xf32>
    %9 = arith.mulf %5, %8 : vector<1x128xf32>
    %10 = arith.mulf %7, %7 : vector<1x128xf32>
    %11 = arith.subf %9, %10 : vector<1x128xf32>
    %cst_4 = arith.constant 9.99999974E-6 : f32
    %12 = vector.broadcast %cst_4 : f32 to vector<1x128xf32>
    %13 = arith.addf %11, %12 : vector<1x128xf32>
    %14 = math.rsqrt %13 : vector<1x128xf32>
    %c0_5 = arith.constant 0 : index
    %c0_6 = arith.constant 0 : index
    %15 = vector.load %arg1[%c0_5, %c0_6] : memref<1x128xf32, #tpu.memory_space<vmem>>, vector<1x128xf32>
    %16 = arith.mulf %15, %14 : vector<1x128xf32>
    %c0_7 = arith.constant 0 : index
    %c0_8 = arith.constant 0 : index
    %17 = vector.load %arg2[%c0_7, %c0_8] : memref<1x128xf32, #tpu.memory_space<vmem>>, vector<1x128xf32>
    %18 = arith.mulf %7, %16 : vector<1x128xf32>
    %19 = arith.subf %17, %18 : vector<1x128xf32>
    %20 = vector.broadcast %16 : vector<1x128xf32> to vector<784x128xf32>
    %21 = arith.mulf %0, %20 : vector<784x128xf32>
    %22 = vector.broadcast %19 : vector<1x128xf32> to vector<784x128xf32>
    %23 = arith.addf %21, %22 : vector<784x128xf32>
    %c0_9 = arith.constant 0 : index
    %c0_10 = arith.constant 0 : index
    %24 = vector.load %arg3[%c0_9, %c0_10] : memref<784x128xf32, #tpu.memory_space<vmem>>, vector<784x128xf32>
    tpu.vector_store %arg3[%c0_9, %c0_10], %23 {strides = array<i32>} : memref<784x128xf32, #tpu.memory_space<vmem>>, vector<784x128xf32>,
    return
  }
}

</mosaic_0001>

<bundles_post_ra>
// kernel: tpu_custom_call.1
= control target key start
LH: loop header
LB: loop body
LE: loop exit
PB: predicated region body
PF: predicated region fallthrough
CT: control target
= control target key end

     0   :  { %8 = vsyncpa [#allocation3], 0  ;;  %s1703_s0 = inlined_call_operand.hbm [shape: f32[784,128], index: 0, kind: input, shape index: {}]   ;;  %s1704_s1 = inlined_call_operand.hbm [shape: f32[1,128], index: 1, kind: input, shape index: {}]   ;;  %s1705_s2 = inlined_call_operand.vmem [shape: f32[1,128], index: 2, kind: input, shape index: {}]   ;;  %s1706_s3 = inlined_call_operand.hbm [shape: f32[784,128], index: 3, kind: output, shape index: {}]  }
   0x1   :  { %9 = vsyncpa [#allocation6], 0 }
   0x2   :  { %10 = vsyncpa [#allocation4], 0  ;;  %s15_s14 = sshll.u32 %s1703_s0, 4  ;;  %s872_s15 = smov [#allocation2]   ;;  %s16_s14 = int_to_ptr.hbm [resolvable:$true] %s15_s14 }
   0x3   :  { %s17_s16 = sshll.u32 %s872_s15, 4  ;;  %s29_s19 = sshll.u32 %s1704_s1, 4  ;;  %s18_s16 = int_to_ptr.vmem [resolvable:$true] %s17_s16  ;;  %s30_s19 = int_to_ptr.hbm [resolvable:$true] %s29_s19 }
   0x4   :  { %s873_s20 = smov 128   ;;  %s874_s21 = smov 8  }
   0x5   :  { %23 = dma.hbm_to_vmem [thread:$0]  %s16_s14, 12544, %s18_s16, [#allocation3], %s873_s20, %s873_s20, %s874_s21  }
   0x6   :  { %s875_s22 = smov [#allocation5]  }
   0x7   :  { %s31_s23 = sshll.u32 %s875_s22, 4  ;;  %s32_s23 = int_to_ptr.vmem [resolvable:$true] %s31_s23 }
   0x8   :  { %34 = dma.hbm_to_vmem [thread:$0]  %s30_s19, 16, %s32_s23, [#allocation6]  }
   0x9   :  { %866 = dma.done.wait [#allocation3], 12544  }
   0xa   :  { %867 = vsyncadd [#allocation3], 4294954752 }
   0xb   :  { %868 = dma.done.wait [#allocation6], 16  }
   0xc   :  { %869 = vsyncadd [#allocation6], 4294967280  ;;  %v906_v0 = vld [vmem:[#allocation2] sm:$0xff]  ;;  %v908_v1 = vld [vmem:[#allocation2 + $0x8] sm:$0xff]  ;;  %s773_s27 = sshll.u32 %s1706_s3, 4  ;;  %s774_s27 = int_to_ptr.hbm [resolvable:$true] %s773_s27 }
   0xd   :  { %v910_v2 = vld [vmem:[#allocation2 + $0x10] sm:$0xff]  ;;  %v912_v3 = vld [vmem:[#allocation2 + $0x18] sm:$0xff]  ;;  %v143_v4 = vadd.f32 %v908_v1, %v906_v0  ;;  %v246_v5 = vmul.f32 %v906_v0, %v906_v0  ;;  %v247_v6 = vmul.f32 %v908_v1, %v908_v1  ;;  %v922_v8 = vld [vmem:[#allocation2 + $0x20] sm:$0xff] }
   0xe   :  { %v248_v7 = vmul.f32 %v910_v2, %v910_v2  ;;  %v249_v10 = vmul.f32 %v912_v3, %v912_v3  ;;  %v927_v12 = vld [vmem:[#allocation2 + $0x28] sm:$0xff]  ;;  %v250_v14 = vmul.f32 %v922_v8, %v922_v8  ;;  %v932_v16 = vld [vmem:[#allocation2 + $0x30] sm:$0xff]  ;;  %v937_v20 = vld [vmem:[#allocation2 + $0x38] sm:$0xff] }
   0xf   :  { %v144_v9 = vadd.f32 %v143_v4, %v910_v2  ;;  %v344_v11 = vadd.f32 %v247_v6, %v246_v5  ;;  %v251_v18 = vmul.f32 %v927_v12, %v927_v12  ;;  %v252_v22 = vmul.f32 %v932_v16, %v932_v16  ;;  %v942_v24 = vld [vmem:[#allocation2 + $0x40] sm:$0xff]  ;;  %v947_v28 = vld [vmem:[#allocation2 + $0x48] sm:$0xff]  ;;  %v952_v32 = vld [vmem:[#allocation2 + $0x50] sm:$0xff] }
  0x10   :  { %v253_v26 = vmul.f32 %v937_v20, %v937_v20  ;;  %v254_v30 = vmul.f32 %v942_v24, %v942_v24  ;;  %v255_v34 = vmul.f32 %v947_v28, %v947_v28  ;;  %v957_v36 = vld [vmem:[#allocation2 + $0x58] sm:$0xff]  ;;  %v256_v38 = vmul.f32 %v952_v32, %v952_v32  ;;  %v962_v40 = vld [vmem:[#allocation2 + $0x60] sm:$0xff]  ;;  %v967_v44 = vld [vmem:[#allocation2 + $0x68] sm:$0xff] }
  0x11   :  { %v145_v13 = vadd.f32 %v144_v9, %v912_v3  ;;  %v345_v15 = vadd.f32 %v344_v11, %v248_v7  ;;  %v257_v42 = vmul.f32 %v957_v36, %v957_v36  ;;  %v258_v46 = vmul.f32 %v962_v40, %v962_v40  ;;  %v972_v48 = vld [vmem:[#allocation2 + $0x70] sm:$0xff]  ;;  %v977_v52 = vld [vmem:[#allocation2 + $0x78] sm:$0xff]  ;;  %v982_v56 = vld [vmem:[#allocation2 + $0x80] sm:$0xff] }
  0x12   :  { %v259_v50 = vmul.f32 %v967_v44, %v967_v44  ;;  %v260_v54 = vmul.f32 %v972_v48, %v972_v48  ;;  %v261_v58 = vmul.f32 %v977_v52, %v977_v52  ;;  %v987_v60 = vld [vmem:[#allocation2 + $0x88] sm:$0xff]  ;;  %v262_v62 = vmul.f32 %v982_v56, %v982_v56  ;;  %v992_v4 = vld [vmem:[#allocation2 + $0x90] sm:$0xff]  ;;  %v997_v9 = vld [vmem:[#allocation2 + $0x98] sm:$0xff] }
  0x13   :  { %v146_v17 = vadd.f32 %v145_v13, %v922_v8  ;;  %v346_v19 = vadd.f32 %v345_v15, %v249_v10  ;;  %v263_v6 = vmul.f32 %v987_v60, %v987_v60  ;;  %v264_v11 = vmul.f32 %v992_v4, %v992_v4 }
  0x15   :  { %v147_v21 = vadd.f32 %v146_v17, %v927_v12  ;;  %v347_v23 = vadd.f32 %v346_v19, %v250_v14  ;;  %v1002_v14 = vld [vmem:[#allocation2 + $0xa0] sm:$0xff]  ;;  %v265_v17 = vmul.f32 %v997_v9, %v997_v9  ;;  %v1007_v19 = vld [vmem:[#allocation2 + $0xa8] sm:$0xff] }
  0x17   :  { %v148_v25 = vadd.f32 %v147_v21, %v932_v16  ;;  %v348_v27 = vadd.f32 %v347_v23, %v251_v18 }
  0x19   :  { %v149_v29 = vadd.f32 %v148_v25, %v937_v20  ;;  %v349_v31 = vadd.f32 %v348_v27, %v252_v22  ;;  %v266_v22 = vmul.f32 %v1002_v14, %v1002_v14  ;;  %v1012_v25 = vld [vmem:[#allocation2 + $0xb0] sm:$0xff]  ;;  %v267_v27 = vmul.f32 %v1007_v19, %v1007_v19 }
  0x1b   :  { %v150_v33 = vadd.f32 %v149_v29, %v942_v24  ;;  %v350_v35 = vadd.f32 %v349_v31, %v253_v26 }
  0x1d   :  { %v151_v37 = vadd.f32 %v150_v33, %v947_v28  ;;  %v351_v39 = vadd.f32 %v350_v35, %v254_v30  ;;  %v1017_v30 = vld [vmem:[#allocation2 + $0xb8] sm:$0xff]  ;;  %v268_v33 = vmul.f32 %v1012_v25, %v1012_v25  ;;  %v1022_v35 = vld [vmem:[#allocation2 + $0xc0] sm:$0xff] }
  0x1f   :  { %v152_v41 = vadd.f32 %v151_v37, %v952_v32  ;;  %v352_v43 = vadd.f32 %v351_v39, %v255_v34 }
  0x21   :  { %v153_v45 = vadd.f32 %v152_v41, %v957_v36  ;;  %v353_v47 = vadd.f32 %v352_v43, %v256_v38  ;;  %v269_v38 = vmul.f32 %v1017_v30, %v1017_v30  ;;  %v1027_v41 = vld [vmem:[#allocation2 + $0xc8] sm:$0xff]  ;;  %v270_v43 = vmul.f32 %v1022_v35, %v1022_v35 }
  0x23   :  { %v154_v49 = vadd.f32 %v153_v45, %v962_v40  ;;  %v354_v51 = vadd.f32 %v353_v47, %v257_v42 }
  0x25   :  { %v155_v53 = vadd.f32 %v154_v49, %v967_v44  ;;  %v355_v55 = vadd.f32 %v354_v51, %v258_v46  ;;  %v1032_v46 = vld [vmem:[#allocation2 + $0xd0] sm:$0xff]  ;;  %v271_v49 = vmul.f32 %v1027_v41, %v1027_v41  ;;  %v1037_v51 = vld [vmem:[#allocation2 + $0xd8] sm:$0xff] }
  0x27   :  { %v156_v57 = vadd.f32 %v155_v53, %v972_v48  ;;  %v356_v59 = vadd.f32 %v355_v55, %v259_v50 }
  0x29   :  { %v157_v61 = vadd.f32 %v156_v57, %v977_v52  ;;  %v357_v63 = vadd.f32 %v356_v59, %v260_v54  ;;  %v272_v54 = vmul.f32 %v1032_v46, %v1032_v46  ;;  %v1042_v57 = vld [vmem:[#allocation2 + $0xe0] sm:$0xff]  ;;  %v273_v59 = vmul.f32 %v1037_v51, %v1037_v51 }
  0x2b   :  { %v158_v5 = vadd.f32 %v157_v61, %v982_v56  ;;  %v358_v7 = vadd.f32 %v357_v63, %v261_v58 }
  0x2d   :  { %v159_v10 = vadd.f32 %v158_v5, %v987_v60  ;;  %v359_v13 = vadd.f32 %v358_v7, %v262_v62  ;;  %v1047_v62 = vld [vmem:[#allocation2 + $0xe8] sm:$0xff]  ;;  %v274_v5 = vmul.f32 %v1042_v57, %v1042_v57  ;;  %v1052_v7 = vld [vmem:[#allocation2 + $0xf0] sm:$0xff] }
  0x2f   :  { %v160_v15 = vadd.f32 %v159_v10, %v992_v4  ;;  %v360_v18 = vadd.f32 %v359_v13, %v263_v6 }
  0x31   :  { %v161_v21 = vadd.f32 %v160_v15, %v997_v9  ;;  %v361_v23 = vadd.f32 %v360_v18, %v264_v11  ;;  %v275_v11 = vmul.f32 %v1047_v62, %v1047_v62  ;;  %v1057_v15 = vld [vmem:[#allocation2 + $0xf8] sm:$0xff]  ;;  %v276_v18 = vmul.f32 %v1052_v7, %v1052_v7 }
  0x33   :  { %v162_v26 = vadd.f32 %v161_v21, %v1002_v14  ;;  %v362_v29 = vadd.f32 %v361_v23, %v265_v17 }
  0x35   :  { %v163_v31 = vadd.f32 %v162_v26, %v1007_v19  ;;  %v363_v34 = vadd.f32 %v362_v29, %v266_v22  ;;  %v1062_v22 = vld [vmem:[#allocation2 + $0x100] sm:$0xff]  ;;  %v277_v26 = vmul.f32 %v1057_v15, %v1057_v15  ;;  %v1067_v29 = vld [vmem:[#allocation2 + $0x108] sm:$0xff] }
  0x37   :  { %v164_v37 = vadd.f32 %v163_v31, %v1012_v25  ;;  %v364_v39 = vadd.f32 %v363_v34, %v267_v27 }
  0x39   :  { %v165_v42 = vadd.f32 %v164_v37, %v1017_v30  ;;  %v365_v45 = vadd.f32 %v364_v39, %v268_v33  ;;  %v278_v33 = vmul.f32 %v1062_v22, %v1062_v22  ;;  %v1072_v37 = vld [vmem:[#allocation2 + $0x110] sm:$0xff]  ;;  %v279_v39 = vmul.f32 %v1067_v29, %v1067_v29 }
  0x3b   :  { %v166_v47 = vadd.f32 %v165_v42, %v1022_v35  ;;  %v366_v50 = vadd.f32 %v365_v45, %v269_v38 }
  0x3d   :  { %v167_v53 = vadd.f32 %v166_v47, %v1027_v41  ;;  %v367_v55 = vadd.f32 %v366_v50, %v270_v43  ;;  %v1077_v43 = vld [vmem:[#allocation2 + $0x118] sm:$0xff]  ;;  %v280_v47 = vmul.f32 %v1072_v37, %v1072_v37  ;;  %v1082_v50 = vld [vmem:[#allocation2 + $0x120] sm:$0xff] }
  0x3f   :  { %v168_v58 = vadd.f32 %v167_v53, %v1032_v46  ;;  %v368_v61 = vadd.f32 %v367_v55, %v271_v49 }
  0x41   :  { %v169_v63 = vadd.f32 %v168_v58, %v1037_v51  ;;  %v369_v6 = vadd.f32 %v368_v61, %v272_v54  ;;  %v281_v54 = vmul.f32 %v1077_v43, %v1077_v43  ;;  %v1087_v58 = vld [vmem:[#allocation2 + $0x128] sm:$0xff]  ;;  %v282_v61 = vmul.f32 %v1082_v50, %v1082_v50 }
  0x43   :  { %v170_v10 = vadd.f32 %v169_v63, %v1042_v57  ;;  %v370_v13 = vadd.f32 %v369_v6, %v273_v59 }
  0x45   :  { %v171_v17 = vadd.f32 %v170_v10, %v1047_v62  ;;  %v371_v21 = vadd.f32 %v370_v13, %v274_v5  ;;  %v1092_v5 = vld [vmem:[#allocation2 + $0x130] sm:$0xff]  ;;  %v283_v10 = vmul.f32 %v1087_v58, %v1087_v58  ;;  %v1097_v13 = vld [vmem:[#allocation2 + $0x138] sm:$0xff] }
  0x46   :  { %1765 = vst [vmem:[#allocation11_spill] sm:$0xff] %v1097_v13 }
  0x47   :  { %v172_v23 = vadd.f32 %v171_v17, %v1052_v7  ;;  %v372_v27 = vadd.f32 %v371_v21, %v275_v11 }
  0x49   :  { %v173_v31 = vadd.f32 %v172_v23, %v1057_v15  ;;  %v373_v34 = vadd.f32 %v372_v27, %v276_v18  ;;  %v284_v18 = vmul.f32 %v1092_v5, %v1092_v5  ;;  %v1102_v23 = vld [vmem:[#allocation2 + $0x140] sm:$0xff]  ;;  %v285_v27 = vmul.f32 %v1097_v13, %v1097_v13 }
  0x4a   :  { %1766 = vst [vmem:[#allocation12_spill] sm:$0xff] %v1102_v23 }
  0x4b   :  { %v174_v38 = vadd.f32 %v173_v31, %v1062_v22  ;;  %v374_v42 = vadd.f32 %v373_v34, %v277_v26 }
  0x4d   :  { %v175_v45 = vadd.f32 %v174_v38, %v1067_v29  ;;  %v375_v49 = vadd.f32 %v374_v42, %v278_v33  ;;  %v1107_v33 = vld [vmem:[#allocation2 + $0x148] sm:$0xff]  ;;  %v286_v38 = vmul.f32 %v1102_v23, %v1102_v23  ;;  %v1112_v42 = vld [vmem:[#allocation2 + $0x150] sm:$0xff] }
  0x4e   :  { %1767 = vst [vmem:[#allocation13_spill] sm:$0xff] %v1107_v33 }
  0x4f   :  { %v176_v53 = vadd.f32 %v175_v45, %v1072_v37  ;;  %v376_v55 = vadd.f32 %v375_v49, %v279_v39  ;;  %1768 = vst [vmem:[#allocation14_spill] sm:$0xff] %v1112_v42 }
  0x51   :  { %v177_v59 = vadd.f32 %v176_v53, %v1077_v43  ;;  %v377_v63 = vadd.f32 %v376_v55, %v280_v47  ;;  %v287_v47 = vmul.f32 %v1107_v33, %v1107_v33  ;;  %v1117_v53 = vld [vmem:[#allocation2 + $0x158] sm:$0xff]  ;;  %v288_v55 = vmul.f32 %v1112_v42, %v1112_v42 }
  0x52   :  { %1769 = vst [vmem:[#allocation15_spill] sm:$0xff] %v1117_v53 }
  0x53   :  { %v178_v6 = vadd.f32 %v177_v59, %v1082_v50  ;;  %v378_v11 = vadd.f32 %v377_v63, %v281_v54 }
  0x55   :  { %v179_v17 = vadd.f32 %v178_v6, %v1087_v58  ;;  %v379_v21 = vadd.f32 %v378_v11, %v282_v61  ;;  %v1122_v61 = vld [vmem:[#allocation2 + $0x160] sm:$0xff]  ;;  %v289_v6 = vmul.f32 %v1117_v53, %v1117_v53  ;;  %v1127_v11 = vld [vmem:[#allocation2 + $0x168] sm:$0xff] }
  0x56   :  { %1770 = vst [vmem:[#allocation16_spill] sm:$0xff] %v1122_v61 }
  0x57   :  { %v180_v26 = vadd.f32 %v179_v17, %v1092_v5  ;;  %v380_v31 = vadd.f32 %v379_v21, %v283_v10  ;;  %1771 = vst [vmem:[#allocation17_spill] sm:$0xff] %v1127_v11 }
  0x59   :  { %v181_v34 = vadd.f32 %v180_v26, %v1097_v13  ;;  %v381_v39 = vadd.f32 %v380_v31, %v284_v18  ;;  %v290_v18 = vmul.f32 %v1122_v61, %v1122_v61  ;;  %v1132_v26 = vld [vmem:[#allocation2 + $0x170] sm:$0xff]  ;;  %v291_v31 = vmul.f32 %v1127_v11, %v1127_v11 }
  0x5a   :  { %1772 = vst [vmem:[#allocation18_spill] sm:$0xff] %v1132_v26 }
  0x5b   :  { %v182_v45 = vadd.f32 %v181_v34, %v1102_v23  ;;  %v382_v49 = vadd.f32 %v381_v39, %v285_v27 }
  0x5d   :  { %v183_v54 = vadd.f32 %v182_v45, %v1107_v33  ;;  %v383_v59 = vadd.f32 %v382_v49, %v286_v38  ;;  %v1137_v38 = vld [vmem:[#allocation2 + $0x178] sm:$0xff]  ;;  %v292_v45 = vmul.f32 %v1132_v26, %v1132_v26  ;;  %v1142_v49 = vld [vmem:[#allocation2 + $0x180] sm:$0xff] }
  0x5e   :  { %1773 = vst [vmem:[#allocation19_spill] sm:$0xff] %v1137_v38 }
  0x5f   :  { %v184_v63 = vadd.f32 %v183_v54, %v1112_v42  ;;  %v384_v10 = vadd.f32 %v383_v59, %v287_v47  ;;  %1774 = vst [vmem:[#allocation20_spill] sm:$0xff] %v1142_v49 }
  0x61   :  { %v185_v17 = vadd.f32 %v184_v63, %v1117_v53  ;;  %v385_v21 = vadd.f32 %v384_v10, %v288_v55  ;;  %v293_v55 = vmul.f32 %v1137_v38, %v1137_v38  ;;  %v1147_v63 = vld [vmem:[#allocation2 + $0x188] sm:$0xff]  ;;  %v294_v10 = vmul.f32 %v1142_v49, %v1142_v49 }
  0x62   :  { %1775 = vst [vmem:[#allocation21_spill] sm:$0xff] %v1147_v63 }
  0x63   :  { %v186_v27 = vadd.f32 %v185_v17, %v1122_v61  ;;  %v386_v34 = vadd.f32 %v385_v21, %v289_v6  ;;  %v1152_v21 = vld [vmem:[#allocation2 + $0x190] sm:$0xff] }
  0x64   :  { %1776 = vst [vmem:[#allocation22_spill] sm:$0xff] %v1152_v21 }
  0x65   :  { %v187_v39 = vadd.f32 %v186_v27, %v1127_v11  ;;  %v387_v47 = vadd.f32 %v386_v34, %v290_v18  ;;  %v295_v27 = vmul.f32 %v1147_v63, %v1147_v63 }
  0x67   :  { %v188_v54 = vadd.f32 %v187_v39, %v1132_v26  ;;  %v388_v59 = vadd.f32 %v387_v47, %v291_v31  ;;  %v1157_v39 = vld [vmem:[#allocation2 + $0x198] sm:$0xff]  ;;  %v296_v47 = vmul.f32 %v1152_v21, %v1152_v21 }
  0x68   :  { %1777 = vst [vmem:[#allocation23_spill] sm:$0xff] %v1157_v39 }
  0x69   :  { %v189_v6 = vadd.f32 %v188_v54, %v1137_v38  ;;  %v389_v17 = vadd.f32 %v388_v59, %v292_v45  ;;  %v1162_v38 = vld [vmem:[#allocation2 + $0x1a0] sm:$0xff]  ;;  %v297_v59 = vmul.f32 %v1157_v39, %v1157_v39 }
  0x6a   :  { %1778 = vst [vmem:[#allocation24_spill] sm:$0xff] %v1162_v38 }
  0x6b   :  { %v190_v18 = vadd.f32 %v189_v6, %v1142_v49  ;;  %v390_v34 = vadd.f32 %v389_v17, %v293_v55  ;;  %v1167_v49 = vld [vmem:[#allocation2 + $0x1a8] sm:$0xff]  ;;  %v298_v17 = vmul.f32 %v1162_v38, %v1162_v38 }
  0x6c   :  { %1779 = vst [vmem:[#allocation25_spill] sm:$0xff] %v1167_v49 }
  0x6d   :  { %v191_v31 = vadd.f32 %v190_v18, %v1147_v63  ;;  %v391_v54 = vadd.f32 %v390_v34, %v294_v10  ;;  %v1172_v63 = vld [vmem:[#allocation2 + $0x1b0] sm:$0xff]  ;;  %v299_v34 = vmul.f32 %v1167_v49, %v1167_v49 }
  0x6e   :  { %1780 = vst [vmem:[#allocation26_spill] sm:$0xff] %v1172_v63 }
  0x6f   :  { %v192_v45 = vadd.f32 %v191_v31, %v1152_v21  ;;  %v392_v6 = vadd.f32 %v391_v54, %v295_v27  ;;  %v1177_v21 = vld [vmem:[#allocation2 + $0x1b8] sm:$0xff]  ;;  %v300_v54 = vmul.f32 %v1172_v63, %v1172_v63 }
  0x70   :  { %1781 = vst [vmem:[#allocation27_spill] sm:$0xff] %v1177_v21 }
  0x71   :  { %v193_v55 = vadd.f32 %v192_v45, %v1157_v39  ;;  %v393_v18 = vadd.f32 %v392_v6, %v296_v47  ;;  %v1182_v39 = vld [vmem:[#allocation2 + $0x1c0] sm:$0xff]  ;;  %v301_v6 = vmul.f32 %v1177_v21, %v1177_v21 }
  0x72   :  { %1782 = vst [vmem:[#allocation28_spill] sm:$0xff] %v1182_v39 }
  0x73   :  { %v194_v10 = vadd.f32 %v193_v55, %v1162_v38  ;;  %v394_v31 = vadd.f32 %v393_v18, %v297_v59  ;;  %v1187_v38 = vld [vmem:[#allocation2 + $0x1c8] sm:$0xff]  ;;  %v302_v18 = vmul.f32 %v1182_v39, %v1182_v39 }
  0x74   :  { %1783 = vst [vmem:[#allocation29_spill] sm:$0xff] %v1187_v38 }
  0x75   :  { %v195_v27 = vadd.f32 %v194_v10, %v1167_v49  ;;  %v395_v45 = vadd.f32 %v394_v31, %v298_v17  ;;  %v1192_v49 = vld [vmem:[#allocation2 + $0x1d0] sm:$0xff]  ;;  %v303_v31 = vmul.f32 %v1187_v38, %v1187_v38 }
  0x76   :  { %1784 = vst [vmem:[#allocation30_spill] sm:$0xff] %v1192_v49 }
  0x77   :  { %v196_v47 = vadd.f32 %v195_v27, %v1172_v63  ;;  %v396_v55 = vadd.f32 %v395_v45, %v299_v34  ;;  %v1197_v63 = vld [vmem:[#allocation2 + $0x1d8] sm:$0xff]  ;;  %v304_v45 = vmul.f32 %v1192_v49, %v1192_v49 }
  0x78   :  { %1785 = vst [vmem:[#allocation31_spill] sm:$0xff] %v1197_v63 }
  0x79   :  { %v197_v59 = vadd.f32 %v196_v47, %v1177_v21  ;;  %v397_v10 = vadd.f32 %v396_v55, %v300_v54  ;;  %v1202_v21 = vld [vmem:[#allocation2 + $0x1e0] sm:$0xff]  ;;  %v305_v55 = vmul.f32 %v1197_v63, %v1197_v63 }
  0x7a   :  { %1786 = vst [vmem:[#allocation32_spill] sm:$0xff] %v1202_v21 }
  0x7b   :  { %v198_v17 = vadd.f32 %v197_v59, %v1182_v39  ;;  %v398_v27 = vadd.f32 %v397_v10, %v301_v6  ;;  %v1207_v39 = vld [vmem:[#allocation2 + $0x1e8] sm:$0xff]  ;;  %v306_v10 = vmul.f32 %v1202_v21, %v1202_v21 }
  0x7c   :  { %1787 = vst [vmem:[#allocation33_spill] sm:$0xff] %v1207_v39 }
  0x7d   :  { %v199_v34 = vadd.f32 %v198_v17, %v1187_v38  ;;  %v399_v47 = vadd.f32 %v398_v27, %v302_v18  ;;  %v1212_v38 = vld [vmem:[#allocation2 + $0x1f0] sm:$0xff]  ;;  %v307_v27 = vmul.f32 %v1207_v39, %v1207_v39 }
  0x7e   :  { %1788 = vst [vmem:[#allocation34_spill] sm:$0xff] %v1212_v38 }
  0x7f   :  { %v200_v54 = vadd.f32 %v199_v34, %v1192_v49  ;;  %v400_v59 = vadd.f32 %v399_v47, %v303_v31  ;;  %v1217_v49 = vld [vmem:[#allocation2 + $0x1f8] sm:$0xff]  ;;  %v308_v47 = vmul.f32 %v1212_v38, %v1212_v38 }
  0x80   :  { %1789 = vst [vmem:[#allocation35_spill] sm:$0xff] %v1217_v49 }
  0x81   :  { %v201_v6 = vadd.f32 %v200_v54, %v1197_v63  ;;  %v401_v17 = vadd.f32 %v400_v59, %v304_v45  ;;  %v1222_v63 = vld [vmem:[#allocation2 + $0x200] sm:$0xff]  ;;  %v309_v59 = vmul.f32 %v1217_v49, %v1217_v49 }
  0x82   :  { %1790 = vst [vmem:[#allocation36_spill] sm:$0xff] %v1222_v63 }
  0x83   :  { %v202_v18 = vadd.f32 %v201_v6, %v1202_v21  ;;  %v402_v34 = vadd.f32 %v401_v17, %v305_v55  ;;  %v1227_v21 = vld [vmem:[#allocation2 + $0x208] sm:$0xff]  ;;  %v310_v17 = vmul.f32 %v1222_v63, %v1222_v63 }
  0x84   :  { %1791 = vst [vmem:[#allocation37_spill] sm:$0xff] %v1227_v21 }
  0x85   :  { %v203_v31 = vadd.f32 %v202_v18, %v1207_v39  ;;  %v403_v54 = vadd.f32 %v402_v34, %v306_v10  ;;  %v1232_v39 = vld [vmem:[#allocation2 + $0x210] sm:$0xff]  ;;  %v311_v34 = vmul.f32 %v1227_v21, %v1227_v21 }
  0x86   :  { %1792 = vst [vmem:[#allocation38_spill] sm:$0xff] %v1232_v39 }
  0x87   :  { %v204_v45 = vadd.f32 %v203_v31, %v1212_v38  ;;  %v404_v6 = vadd.f32 %v403_v54, %v307_v27  ;;  %v1237_v38 = vld [vmem:[#allocation2 + $0x218] sm:$0xff]  ;;  %v312_v54 = vmul.f32 %v1232_v39, %v1232_v39 }
  0x88   :  { %1793 = vst [vmem:[#allocation39_spill] sm:$0xff] %v1237_v38 }
  0x89   :  { %v205_v55 = vadd.f32 %v204_v45, %v1217_v49  ;;  %v405_v18 = vadd.f32 %v404_v6, %v308_v47  ;;  %v1242_v49 = vld [vmem:[#allocation2 + $0x220] sm:$0xff]  ;;  %v313_v6 = vmul.f32 %v1237_v38, %v1237_v38 }
  0x8a   :  { %1794 = vst [vmem:[#allocation40_spill] sm:$0xff] %v1242_v49 }
  0x8b   :  { %v206_v10 = vadd.f32 %v205_v55, %v1222_v63  ;;  %v406_v31 = vadd.f32 %v405_v18, %v309_v59  ;;  %v1247_v63 = vld [vmem:[#allocation2 + $0x228] sm:$0xff]  ;;  %v314_v18 = vmul.f32 %v1242_v49, %v1242_v49 }
  0x8c   :  { %1795 = vst [vmem:[#allocation41_spill] sm:$0xff] %v1247_v63 }
  0x8d   :  { %v207_v27 = vadd.f32 %v206_v10, %v1227_v21  ;;  %v407_v45 = vadd.f32 %v406_v31, %v310_v17  ;;  %v1252_v21 = vld [vmem:[#allocation2 + $0x230] sm:$0xff]  ;;  %v315_v31 = vmul.f32 %v1247_v63, %v1247_v63 }
  0x8e   :  { %1796 = vst [vmem:[#allocation42_spill] sm:$0xff] %v1252_v21 }
  0x8f   :  { %v208_v47 = vadd.f32 %v207_v27, %v1232_v39  ;;  %v408_v55 = vadd.f32 %v407_v45, %v311_v34  ;;  %v1257_v39 = vld [vmem:[#allocation2 + $0x238] sm:$0xff]  ;;  %v316_v45 = vmul.f32 %v1252_v21, %v1252_v21 }
  0x90   :  { %1797 = vst [vmem:[#allocation43_spill] sm:$0xff] %v1257_v39 }
  0x91   :  { %v209_v59 = vadd.f32 %v208_v47, %v1237_v38  ;;  %v409_v10 = vadd.f32 %v408_v55, %v312_v54  ;;  %v1262_v38 = vld [vmem:[#allocation2 + $0x240] sm:$0xff]  ;;  %v317_v55 = vmul.f32 %v1257_v39, %v1257_v39 }
  0x92   :  { %1798 = vst [vmem:[#allocation44_spill] sm:$0xff] %v1262_v38 }
  0x93   :  { %v210_v17 = vadd.f32 %v209_v59, %v1242_v49  ;;  %v410_v27 = vadd.f32 %v409_v10, %v313_v6  ;;  %v1267_v49 = vld [vmem:[#allocation2 + $0x248] sm:$0xff]  ;;  %v318_v10 = vmul.f32 %v1262_v38, %v1262_v38 }
  0x94   :  { %1799 = vst [vmem:[#allocation45_spill] sm:$0xff] %v1267_v49 }
  0x95   :  { %v211_v34 = vadd.f32 %v210_v17, %v1247_v63  ;;  %v411_v47 = vadd.f32 %v410_v27, %v314_v18  ;;  %v1272_v63 = vld [vmem:[#allocation2 + $0x250] sm:$0xff]  ;;  %v319_v27 = vmul.f32 %v1267_v49, %v1267_v49 }
  0x96   :  { %1800 = vst [vmem:[#allocation46_spill] sm:$0xff] %v1272_v63 }
  0x97   :  { %v212_v54 = vadd.f32 %v211_v34, %v1252_v21  ;;  %v412_v59 = vadd.f32 %v411_v47, %v315_v31  ;;  %v1277_v21 = vld [vmem:[#allocation2 + $0x258] sm:$0xff]  ;;  %v320_v47 = vmul.f32 %v1272_v63, %v1272_v63 }
  0x98   :  { %1801 = vst [vmem:[#allocation47_spill] sm:$0xff] %v1277_v21 }
  0x99   :  { %v213_v6 = vadd.f32 %v212_v54, %v1257_v39  ;;  %v413_v17 = vadd.f32 %v412_v59, %v316_v45  ;;  %v1282_v39 = vld [vmem:[#allocation2 + $0x260] sm:$0xff]  ;;  %v321_v59 = vmul.f32 %v1277_v21, %v1277_v21 }
  0x9a   :  { %1802 = vst [vmem:[#allocation48_spill] sm:$0xff] %v1282_v39 }
  0x9b   :  { %v214_v18 = vadd.f32 %v213_v6, %v1262_v38  ;;  %v414_v34 = vadd.f32 %v413_v17, %v317_v55  ;;  %v1287_v38 = vld [vmem:[#allocation2 + $0x268] sm:$0xff]  ;;  %v322_v17 = vmul.f32 %v1282_v39, %v1282_v39 }
  0x9c   :  { %1803 = vst [vmem:[#allocation49_spill] sm:$0xff] %v1287_v38 }
  0x9d   :  { %v215_v31 = vadd.f32 %v214_v18, %v1267_v49  ;;  %v415_v54 = vadd.f32 %v414_v34, %v318_v10  ;;  %v1292_v49 = vld [vmem:[#allocation2 + $0x270] sm:$0xff]  ;;  %v323_v34 = vmul.f32 %v1287_v38, %v1287_v38 }
  0x9e   :  { %1804 = vst [vmem:[#allocation50_spill] sm:$0xff] %v1292_v49 }
  0x9f   :  { %v216_v45 = vadd.f32 %v215_v31, %v1272_v63  ;;  %v416_v6 = vadd.f32 %v415_v54, %v319_v27  ;;  %v1297_v63 = vld [vmem:[#allocation2 + $0x278] sm:$0xff]  ;;  %v324_v54 = vmul.f32 %v1292_v49, %v1292_v49 }
  0xa0   :  { %1805 = vst [vmem:[#allocation51_spill] sm:$0xff] %v1297_v63 }
  0xa1   :  { %v217_v55 = vadd.f32 %v216_v45, %v1277_v21  ;;  %v417_v18 = vadd.f32 %v416_v6, %v320_v47  ;;  %v1302_v21 = vld [vmem:[#allocation2 + $0x280] sm:$0xff]  ;;  %v325_v6 = vmul.f32 %v1297_v63, %v1297_v63 }
  0xa2   :  { %1806 = vst [vmem:[#allocation52_spill] sm:$0xff] %v1302_v21 }
  0xa3   :  { %v218_v10 = vadd.f32 %v217_v55, %v1282_v39  ;;  %v418_v31 = vadd.f32 %v417_v18, %v321_v59  ;;  %v1307_v39 = vld [vmem:[#allocation2 + $0x288] sm:$0xff]  ;;  %v326_v18 = vmul.f32 %v1302_v21, %v1302_v21 }
  0xa4   :  { %1807 = vst [vmem:[#allocation53_spill] sm:$0xff] %v1307_v39 }
  0xa5   :  { %v219_v27 = vadd.f32 %v218_v10, %v1287_v38  ;;  %v419_v45 = vadd.f32 %v418_v31, %v322_v17  ;;  %v1312_v38 = vld [vmem:[#allocation2 + $0x290] sm:$0xff]  ;;  %v327_v31 = vmul.f32 %v1307_v39, %v1307_v39 }
  0xa6   :  { %1808 = vst [vmem:[#allocation54_spill] sm:$0xff] %v1312_v38 }
  0xa7   :  { %v220_v47 = vadd.f32 %v219_v27, %v1292_v49  ;;  %v420_v55 = vadd.f32 %v419_v45, %v323_v34  ;;  %v1317_v49 = vld [vmem:[#allocation2 + $0x298] sm:$0xff]  ;;  %v328_v45 = vmul.f32 %v1312_v38, %v1312_v38 }
  0xa8   :  { %1809 = vst [vmem:[#allocation55_spill] sm:$0xff] %v1317_v49 }
  0xa9   :  { %v221_v59 = vadd.f32 %v220_v47, %v1297_v63  ;;  %v421_v10 = vadd.f32 %v420_v55, %v324_v54  ;;  %v1322_v63 = vld [vmem:[#allocation2 + $0x2a0] sm:$0xff]  ;;  %v329_v55 = vmul.f32 %v1317_v49, %v1317_v49 }
  0xaa   :  { %1810 = vst [vmem:[#allocation56_spill] sm:$0xff] %v1322_v63 }
  0xab   :  { %v222_v17 = vadd.f32 %v221_v59, %v1302_v21  ;;  %v422_v27 = vadd.f32 %v421_v10, %v325_v6  ;;  %v1327_v21 = vld [vmem:[#allocation2 + $0x2a8] sm:$0xff]  ;;  %v330_v10 = vmul.f32 %v1322_v63, %v1322_v63 }
  0xac   :  { %1811 = vst [vmem:[#allocation57_spill] sm:$0xff] %v1327_v21 }
  0xad   :  { %v223_v34 = vadd.f32 %v222_v17, %v1307_v39  ;;  %v423_v47 = vadd.f32 %v422_v27, %v326_v18  ;;  %v1332_v39 = vld [vmem:[#allocation2 + $0x2b0] sm:$0xff]  ;;  %v331_v27 = vmul.f32 %v1327_v21, %v1327_v21 }
  0xae   :  { %1812 = vst [vmem:[#allocation58_spill] sm:$0xff] %v1332_v39 }
  0xaf   :  { %v224_v54 = vadd.f32 %v223_v34, %v1312_v38  ;;  %v424_v59 = vadd.f32 %v423_v47, %v327_v31  ;;  %v1337_v38 = vld [vmem:[#allocation2 + $0x2b8] sm:$0xff]  ;;  %v332_v47 = vmul.f32 %v1332_v39, %v1332_v39 }
  0xb0   :  { %1813 = vst [vmem:[#allocation59_spill] sm:$0xff] %v1337_v38 }
  0xb1   :  { %v225_v6 = vadd.f32 %v224_v54, %v1317_v49  ;;  %v425_v17 = vadd.f32 %v424_v59, %v328_v45  ;;  %v1342_v49 = vld [vmem:[#allocation2 + $0x2c0] sm:$0xff]  ;;  %v333_v59 = vmul.f32 %v1337_v38, %v1337_v38 }
  0xb2   :  { %1814 = vst [vmem:[#allocation60_spill] sm:$0xff] %v1342_v49 }
  0xb3   :  { %v226_v18 = vadd.f32 %v225_v6, %v1322_v63  ;;  %v426_v34 = vadd.f32 %v425_v17, %v329_v55  ;;  %v1347_v63 = vld [vmem:[#allocation2 + $0x2c8] sm:$0xff]  ;;  %v334_v17 = vmul.f32 %v1342_v49, %v1342_v49 }
  0xb4   :  { %1815 = vst [vmem:[#allocation61_spill] sm:$0xff] %v1347_v63 }
  0xb5   :  { %v227_v31 = vadd.f32 %v226_v18, %v1327_v21  ;;  %v427_v54 = vadd.f32 %v426_v34, %v330_v10  ;;  %v1352_v21 = vld [vmem:[#allocation2 + $0x2d0] sm:$0xff]  ;;  %v335_v34 = vmul.f32 %v1347_v63, %v1347_v63 }
  0xb6   :  { %1816 = vst [vmem:[#allocation62_spill] sm:$0xff] %v1352_v21 }
  0xb7   :  { %v228_v45 = vadd.f32 %v227_v31, %v1332_v39  ;;  %v428_v6 = vadd.f32 %v427_v54, %v331_v27  ;;  %v1357_v39 = vld [vmem:[#allocation2 + $0x2d8] sm:$0xff]  ;;  %v336_v54 = vmul.f32 %v1352_v21, %v1352_v21 }
  0xb8   :  { %1817 = vst [vmem:[#allocation63_spill] sm:$0xff] %v1357_v39 }
  0xb9   :  { %v229_v55 = vadd.f32 %v228_v45, %v1337_v38  ;;  %v429_v18 = vadd.f32 %v428_v6, %v332_v47  ;;  %v1362_v38 = vld [vmem:[#allocation2 + $0x2e0] sm:$0xff]  ;;  %v337_v6 = vmul.f32 %v1357_v39, %v1357_v39 }
  0xba   :  { %1818 = vst [vmem:[#allocation64_spill] sm:$0xff] %v1362_v38 }
  0xbb   :  { %v230_v10 = vadd.f32 %v229_v55, %v1342_v49  ;;  %v430_v31 = vadd.f32 %v429_v18, %v333_v59  ;;  %v1367_v49 = vld [vmem:[#allocation2 + $0x2e8] sm:$0xff]  ;;  %v338_v18 = vmul.f32 %v1362_v38, %v1362_v38 }
  0xbc   :  { %1819 = vst [vmem:[#allocation65_spill] sm:$0xff] %v1367_v49 }
  0xbd   :  { %v231_v27 = vadd.f32 %v230_v10, %v1347_v63  ;;  %v431_v45 = vadd.f32 %v430_v31, %v334_v17  ;;  %v1372_v63 = vld [vmem:[#allocation2 + $0x2f0] sm:$0xff]  ;;  %v339_v31 = vmul.f32 %v1367_v49, %v1367_v49 }
  0xbe   :  { %1820 = vst [vmem:[#allocation66_spill] sm:$0xff] %v1372_v63 }
  0xbf   :  { %v232_v47 = vadd.f32 %v231_v27, %v1352_v21  ;;  %v432_v55 = vadd.f32 %v431_v45, %v335_v34  ;;  %v1377_v21 = vld [vmem:[#allocation2 + $0x2f8] sm:$0xff]  ;;  %v340_v45 = vmul.f32 %v1372_v63, %v1372_v63 }
  0xc0   :  { %1821 = vst [vmem:[#allocation67_spill] sm:$0xff] %v1377_v21 }
  0xc1   :  { %v233_v59 = vadd.f32 %v232_v47, %v1357_v39  ;;  %v433_v10 = vadd.f32 %v432_v55, %v336_v54  ;;  %v1382_v39 = vld [vmem:[#allocation2 + $0x300] sm:$0xff]  ;;  %v341_v55 = vmul.f32 %v1377_v21, %v1377_v21 }
  0xc2   :  { %1822 = vst [vmem:[#allocation68_spill] sm:$0xff] %v1382_v39 }
  0xc3   :  { %v234_v17 = vadd.f32 %v233_v59, %v1362_v38  ;;  %v434_v27 = vadd.f32 %v433_v10, %v337_v6  ;;  %v1387_v38 = vld [vmem:[#allocation2 + $0x308] sm:$0xff]  ;;  %v342_v10 = vmul.f32 %v1382_v39, %v1382_v39 }
  0xc5   :  { %v235_v34 = vadd.f32 %v234_v17, %v1367_v49  ;;  %v435_v47 = vadd.f32 %v434_v27, %v338_v18  ;;  %v343_v18 = vmul.f32 %v1387_v38, %v1387_v38 }
  0xc7   :  { %v236_v54 = vadd.f32 %v235_v34, %v1372_v63  ;;  %v436_v59 = vadd.f32 %v435_v47, %v339_v31 }
  0xc9   :  { %v237_v6 = vadd.f32 %v236_v54, %v1377_v21  ;;  %v437_v17 = vadd.f32 %v436_v59, %v340_v45 }
  0xcb   :  { %v238_v49 = vadd.f32 %v237_v6, %v1382_v39  ;;  %v438_v27 = vadd.f32 %v437_v17, %v341_v55 }
  0xcd   :  { %v239_v34 = vadd.f32 %v238_v49, %v1387_v38  ;;  %v439_v63 = vadd.f32 %v438_v27, %v342_v10 }
  0xcf   :  { %v240_v26 = vrot.slane %v239_v34, 4  ;;  %v440_v11 = vadd.f32 %v439_v63, %v343_v18  ;;  %v462_v18 = vld [vmem:[#allocation5] sm:$0x1] }
  0xd1   :  { %v241_v31 = vadd.f32 %v240_v26, %v239_v34  ;;  %v441_v47 = vrot.slane %v440_v11, 4 }
  0xd3   :  { %v242_v61 = vrot.slane %v241_v31, 2  ;;  %v442_v53 = vadd.f32 %v441_v47, %v440_v11 }
  0xd5   :  { %v243_v54 = vadd.f32 %v242_v61, %v241_v31  ;;  %v443_v21 = vrot.slane %v442_v53, 2 }
  0xd7   :  { %v244_v42 = vrot.slane %v243_v54, 1  ;;  %v444_v33 = vadd.f32 %v443_v21, %v442_v53 }
  0xd9   :  { %v245_v45 = vadd.f32 %v244_v42, %v243_v54  ;;  %v445_v59 = vrot.slane %v444_v33, 1 }
  0xdb   :  { %v447_v6 = vmul.f32 0.0012755102, %v245_v45  ;;  %v446_v39 = vadd.f32 %v445_v59, %v444_v33  ;;  %v464_v33 = vld [vmem:[%s1705_s2] sm:$0x1]  ;;  %s876_s2 = smov [#allocation7]  }
  0xdc   :  { %s771_s24 = sshll.u32 %s876_s2, 4  ;;  %s772_s24 = int_to_ptr.vmem [resolvable:$true] %s771_s24 }
  0xdd   :  { %v449_v23 = vmul.f32 %v447_v6, %v447_v6  ;;  %v448_v13 = vmul.f32 0.0012755102, %v446_v39 }
  0xdf   :  { %v450_v55 = vsub.f32 %v448_v13, %v449_v23 }
  0xe1   :  { %v451_v17 = vadd.f32 1e-05, %v450_v55 }
  0xe3   :  { %792 = vrsqrt.f32 %v451_v17  ;;  %vm458_vm0 = vweird.f32 %v451_v17 }
  0xe9   :  { %v793_v49 = vpop.eup %792 }
  0xea   :  { %v453_v10 = vmul.f32 %v793_v49, %v451_v17  ;;  %vm459_vm1 = vweird.f32 %v793_v49 }
  0xeb   :  { %vm460_vm2 = vmor %vm458_vm0, %vm459_vm1 }
  0xec   :  { %v454_v63 = vmul.f32 %v793_v49, %v453_v10 }
  0xee   :  { %v455_v26 = vmul.f32 0.5, %v454_v63 }
  0xf0   :  { %v456_v11 = vsub.f32 1.5, %v455_v26 }
  0xf2   :  { %v457_v61 = vmul.f32 %v793_v49, %v456_v11 }
  0xf4   :  { %v461_v53 = vsel %vm460_vm2, %v793_v49, %v457_v61 }
  0xf5   :  { %v463_v42 = vmul.f32 %v462_v18, %v461_v53 }
  0xf7   :  { %v465_v21 = vmul.f32 %v463_v42, %v447_v6  ;;  %v1399_v13 = vperm.slane %v463_v42, 0 }
  0xf9   :  { %v466_v23 = vsub.f32 %v464_v33, %v465_v21  ;;  %v470_v39 = vmul.f32 %v1399_v13, %v906_v0  ;;  %v471_v27 = vmul.f32 %v1399_v13, %v908_v1  ;;  %v472_v34 = vmul.f32 %v1399_v13, %v910_v2 }
  0xfa   :  { %v473_v31 = vmul.f32 %v1399_v13, %v912_v3  ;;  %v474_v54 = vmul.f32 %v1399_v13, %v922_v8  ;;  %v475_v45 = vmul.f32 %v1399_v13, %v927_v12  ;;  %v476_v2 = vmul.f32 %v1399_v13, %v932_v16 }
  0xfb   :  { %v1409_v47 = vperm.slane %v466_v23, 0  ;;  %v477_v3 = vmul.f32 %v1399_v13, %v937_v20  ;;  %v478_v12 = vmul.f32 %v1399_v13, %v942_v24  ;;  %v479_v17 = vmul.f32 %v1399_v13, %v947_v28 }
  0xfc   :  { %v480_v49 = vmul.f32 %v1399_v13, %v952_v32  ;;  %v481_v10 = vmul.f32 %v1399_v13, %v957_v36  ;;  %v482_v63 = vmul.f32 %v1399_v13, %v962_v40  ;;  %v483_v26 = vmul.f32 %v1399_v13, %v967_v44 }
  0xfd   :  { %v571_v59 = vadd.f32 %v1409_v47, %v470_v39  ;;  %v572_v0 = vadd.f32 %v1409_v47, %v471_v27  ;;  %v573_v1 = vadd.f32 %v1409_v47, %v472_v34  ;;  %v574_v6 = vadd.f32 %v1409_v47, %v473_v31 }
  0xfe   :  { %v575_v8 = vadd.f32 %v1409_v47, %v474_v54  ;;  %v576_v55 = vadd.f32 %v1409_v47, %v475_v45  ;;  %v577_v16 = vadd.f32 %v1409_v47, %v476_v2  ;;  %v578_v20 = vadd.f32 %v1409_v47, %v477_v3 }
  0xff   :  { %669 = vst [vmem:[#allocation7] sm:$0xff] %v571_v59  ;;  %v579_v24 = vadd.f32 %v1409_v47, %v478_v12  ;;  %v580_v28 = vadd.f32 %v1409_v47, %v479_v17  ;;  %v581_v32 = vadd.f32 %v1409_v47, %v480_v49  ;;  %v484_v11 = vmul.f32 %v1399_v13, %v972_v48  ;;  %v1823_v49 = vld [vmem:[#allocation11_spill] sm:$0xff] }
 0x100   :  { %670 = vst [vmem:[#allocation7 + $0x8] sm:$0xff] %v572_v0  ;;  %v582_v36 = vadd.f32 %v1409_v47, %v481_v10  ;;  %v485_v61 = vmul.f32 %v1399_v13, %v977_v52  ;;  %v583_v40 = vadd.f32 %v1409_v47, %v482_v63  ;;  %v486_v18 = vmul.f32 %v1399_v13, %v982_v56  ;;  %v1824_v10 = vld [vmem:[#allocation12_spill] sm:$0xff]  ;;  %v1825_v63 = vld [vmem:[#allocation13_spill] sm:$0xff] }
 0x101   :  { %671 = vst [vmem:[#allocation7 + $0x10] sm:$0xff] %v573_v1  ;;  %v584_v44 = vadd.f32 %v1409_v47, %v483_v26  ;;  %v487_v53 = vmul.f32 %v1399_v13, %v987_v60  ;;  %v585_v48 = vadd.f32 %v1409_v47, %v484_v11  ;;  %v488_v42 = vmul.f32 %v1399_v13, %v992_v4  ;;  %v1826_v26 = vld [vmem:[#allocation14_spill] sm:$0xff] }
 0x102   :  { %672 = vst [vmem:[#allocation7 + $0x18] sm:$0xff] %v574_v6  ;;  %v586_v52 = vadd.f32 %v1409_v47, %v485_v61  ;;  %v489_v33 = vmul.f32 %v1399_v13, %v997_v9  ;;  %v587_v56 = vadd.f32 %v1409_v47, %v486_v18  ;;  %v490_v21 = vmul.f32 %v1399_v13, %v1002_v14  ;;  %v1828_v18 = vld [vmem:[#allocation16_spill] sm:$0xff] }
 0x103   :  { %673 = vst [vmem:[#allocation7 + $0x20] sm:$0xff] %v575_v8  ;;  %v588_v60 = vadd.f32 %v1409_v47, %v487_v53  ;;  %v491_v23 = vmul.f32 %v1399_v13, %v1007_v19  ;;  %v589_v4 = vadd.f32 %v1409_v47, %v488_v42  ;;  %v492_v39 = vmul.f32 %v1399_v13, %v1012_v25 }
 0x104   :  { %674 = vst [vmem:[#allocation7 + $0x28] sm:$0xff] %v576_v55  ;;  %v590_v9 = vadd.f32 %v1409_v47, %v489_v33  ;;  %v493_v27 = vmul.f32 %v1399_v13, %v1017_v30  ;;  %v591_v14 = vadd.f32 %v1409_v47, %v490_v21  ;;  %v494_v34 = vmul.f32 %v1399_v13, %v1022_v35  ;;  %v1830_v33 = vld [vmem:[#allocation18_spill] sm:$0xff] }
 0x105   :  { %675 = vst [vmem:[#allocation7 + $0x30] sm:$0xff] %v577_v16  ;;  %v592_v19 = vadd.f32 %v1409_v47, %v491_v23  ;;  %v495_v31 = vmul.f32 %v1399_v13, %v1027_v41  ;;  %v593_v25 = vadd.f32 %v1409_v47, %v492_v39  ;;  %v496_v54 = vmul.f32 %v1399_v13, %v1032_v46  ;;  %v1832_v39 = vld [vmem:[#allocation20_spill] sm:$0xff] }
 0x106   :  { %676 = vst [vmem:[#allocation7 + $0x38] sm:$0xff] %v578_v20  ;;  %v594_v30 = vadd.f32 %v1409_v47, %v493_v27  ;;  %v497_v45 = vmul.f32 %v1399_v13, %v1037_v51  ;;  %v595_v35 = vadd.f32 %v1409_v47, %v494_v34  ;;  %v498_v59 = vmul.f32 %v1399_v13, %v1042_v57 }
 0x107   :  { %677 = vst [vmem:[#allocation7 + $0x40] sm:$0xff] %v579_v24  ;;  %v596_v41 = vadd.f32 %v1409_v47, %v495_v31  ;;  %v499_v0 = vmul.f32 %v1399_v13, %v1047_v62  ;;  %v597_v46 = vadd.f32 %v1409_v47, %v496_v54  ;;  %v500_v1 = vmul.f32 %v1399_v13, %v1052_v7  ;;  %v1834_v31 = vld [vmem:[#allocation22_spill] sm:$0xff] }
 0x108   :  { %678 = vst [vmem:[#allocation7 + $0x48] sm:$0xff] %v580_v28  ;;  %v598_v51 = vadd.f32 %v1409_v47, %v497_v45  ;;  %v501_v2 = vmul.f32 %v1399_v13, %v1057_v15  ;;  %v599_v57 = vadd.f32 %v1409_v47, %v498_v59  ;;  %v502_v6 = vmul.f32 %v1399_v13, %v1062_v22  ;;  %v1836_v59 = vld [vmem:[#allocation24_spill] sm:$0xff] }
 0x109   :  { %679 = vst [vmem:[#allocation7 + $0x50] sm:$0xff] %v581_v32  ;;  %v600_v62 = vadd.f32 %v1409_v47, %v499_v0  ;;  %v503_v3 = vmul.f32 %v1399_v13, %v1067_v29  ;;  %v601_v7 = vadd.f32 %v1409_v47, %v500_v1  ;;  %v504_v8 = vmul.f32 %v1399_v13, %v1072_v37 }
 0x10a   :  { %680 = vst [vmem:[#allocation7 + $0x58] sm:$0xff] %v582_v36  ;;  %v602_v15 = vadd.f32 %v1409_v47, %v501_v2  ;;  %v505_v12 = vmul.f32 %v1399_v13, %v1077_v43  ;;  %v603_v22 = vadd.f32 %v1409_v47, %v502_v6  ;;  %v506_v55 = vmul.f32 %v1399_v13, %v1082_v50  ;;  %v1827_v36 = vld [vmem:[#allocation15_spill] sm:$0xff]  ;;  %v1838_v2 = vld [vmem:[#allocation26_spill] sm:$0xff] }
 0x10b   :  { %681 = vst [vmem:[#allocation7 + $0x60] sm:$0xff] %v583_v40  ;;  %v604_v29 = vadd.f32 %v1409_v47, %v503_v3  ;;  %v507_v17 = vmul.f32 %v1399_v13, %v1087_v58  ;;  %v605_v37 = vadd.f32 %v1409_v47, %v504_v8  ;;  %v508_v16 = vmul.f32 %v1399_v13, %v1092_v5  ;;  %v1840_v8 = vld [vmem:[#allocation28_spill] sm:$0xff] }
 0x10c   :  { %682 = vst [vmem:[#allocation7 + $0x68] sm:$0xff] %v584_v44  ;;  %v606_v43 = vadd.f32 %v1409_v47, %v505_v12  ;;  %v509_v20 = vmul.f32 %v1399_v13, %v1823_v49  ;;  %v607_v50 = vadd.f32 %v1409_v47, %v506_v55  ;;  %v510_v24 = vmul.f32 %v1399_v13, %v1824_v10 }
 0x10d   :  { %683 = vst [vmem:[#allocation7 + $0x70] sm:$0xff] %v585_v48  ;;  %v608_v58 = vadd.f32 %v1409_v47, %v507_v17  ;;  %v511_v28 = vmul.f32 %v1399_v13, %v1825_v63  ;;  %v609_v5 = vadd.f32 %v1409_v47, %v508_v16  ;;  %v512_v32 = vmul.f32 %v1399_v13, %v1826_v26  ;;  %v1829_v48 = vld [vmem:[#allocation17_spill] sm:$0xff]  ;;  %v1842_v17 = vld [vmem:[#allocation30_spill] sm:$0xff] }
 0x10e   :  { %684 = vst [vmem:[#allocation7 + $0x78] sm:$0xff] %v586_v52  ;;  %v610_v11 = vadd.f32 %v1409_v47, %v509_v20  ;;  %v513_v61 = vmul.f32 %v1399_v13, %v1827_v36  ;;  %v611_v40 = vadd.f32 %v1409_v47, %v510_v24  ;;  %v514_v44 = vmul.f32 %v1399_v13, %v1828_v18 }
 0x10f   :  { %685 = vst [vmem:[#allocation7 + $0x80] sm:$0xff] %v587_v56  ;;  %v612_v53 = vadd.f32 %v1409_v47, %v511_v28  ;;  %v515_v42 = vmul.f32 %v1399_v13, %v1829_v48  ;;  %v613_v52 = vadd.f32 %v1409_v47, %v512_v32  ;;  %v516_v56 = vmul.f32 %v1399_v13, %v1830_v33 }
 0x110   :  { %686 = vst [vmem:[#allocation7 + $0x88] sm:$0xff] %v588_v60  ;;  %v614_v21 = vadd.f32 %v1409_v47, %v513_v61  ;;  %v1831_v60 = vld [vmem:[#allocation19_spill] sm:$0xff] }
 0x111   :  { %687 = vst [vmem:[#allocation7 + $0x90] sm:$0xff] %v589_v4  ;;  %v517_v23 = vmul.f32 %v1399_v13, %v1831_v60  ;;  %v615_v4 = vadd.f32 %v1409_v47, %v514_v44  ;;  %v616_v27 = vadd.f32 %v1409_v47, %v515_v42 }
 0x112   :  { %688 = vst [vmem:[#allocation7 + $0x98] sm:$0xff] %v590_v9  ;;  %v518_v9 = vmul.f32 %v1399_v13, %v1832_v39 }
 0x113   :  { %689 = vst [vmem:[#allocation7 + $0xa0] sm:$0xff] %v591_v14  ;;  %v1833_v14 = vld [vmem:[#allocation21_spill] sm:$0xff]  ;;  %v618_v54 = vadd.f32 %v1409_v47, %v517_v23 }
 0x114   :  { %690 = vst [vmem:[#allocation7 + $0xa8] sm:$0xff] %v592_v19  ;;  %v519_v34 = vmul.f32 %v1399_v13, %v1833_v14  ;;  %v617_v19 = vadd.f32 %v1409_v47, %v516_v56 }
 0x115   :  { %691 = vst [vmem:[#allocation7 + $0xb0] sm:$0xff] %v593_v25  ;;  %v520_v25 = vmul.f32 %v1399_v13, %v1834_v31 }
 0x116   :  { %692 = vst [vmem:[#allocation7 + $0xb8] sm:$0xff] %v594_v30  ;;  %v1835_v30 = vld [vmem:[#allocation23_spill] sm:$0xff]  ;;  %v620_v0 = vadd.f32 %v1409_v47, %v519_v34 }
 0x117   :  { %693 = vst [vmem:[#allocation7 + $0xc0] sm:$0xff] %v595_v35  ;;  %v521_v45 = vmul.f32 %v1399_v13, %v1835_v30  ;;  %v619_v35 = vadd.f32 %v1409_v47, %v518_v9 }
 0x118   :  { %694 = vst [vmem:[#allocation7 + $0xc8] sm:$0xff] %v596_v41  ;;  %v522_v41 = vmul.f32 %v1399_v13, %v1836_v59 }
 0x119   :  { %695 = vst [vmem:[#allocation7 + $0xd0] sm:$0xff] %v597_v46  ;;  %v1837_v46 = vld [vmem:[#allocation25_spill] sm:$0xff]  ;;  %v622_v6 = vadd.f32 %v1409_v47, %v521_v45 }
 0x11a   :  { %696 = vst [vmem:[#allocation7 + $0xd8] sm:$0xff] %v598_v51  ;;  %v523_v1 = vmul.f32 %v1399_v13, %v1837_v46  ;;  %v621_v51 = vadd.f32 %v1409_v47, %v520_v25 }
 0x11b   :  { %697 = vst [vmem:[#allocation7 + $0xe0] sm:$0xff] %v599_v57  ;;  %v524_v57 = vmul.f32 %v1399_v13, %v1838_v2 }
 0x11c   :  { %698 = vst [vmem:[#allocation7 + $0xe8] sm:$0xff] %v600_v62  ;;  %v1839_v62 = vld [vmem:[#allocation27_spill] sm:$0xff]  ;;  %v624_v12 = vadd.f32 %v1409_v47, %v523_v1 }
 0x11d   :  { %699 = vst [vmem:[#allocation7 + $0xf0] sm:$0xff] %v601_v7  ;;  %v525_v3 = vmul.f32 %v1399_v13, %v1839_v62  ;;  %v623_v7 = vadd.f32 %v1409_v47, %v522_v41 }
 0x11e   :  { %700 = vst [vmem:[#allocation7 + $0xf8] sm:$0xff] %v602_v15  ;;  %v526_v15 = vmul.f32 %v1399_v13, %v1840_v8 }
 0x11f   :  { %701 = vst [vmem:[#allocation7 + $0x100] sm:$0xff] %v603_v22  ;;  %v1841_v22 = vld [vmem:[#allocation29_spill] sm:$0xff]  ;;  %v626_v16 = vadd.f32 %v1409_v47, %v525_v3 }
 0x120   :  { %702 = vst [vmem:[#allocation7 + $0x108] sm:$0xff] %v604_v29  ;;  %v527_v55 = vmul.f32 %v1399_v13, %v1841_v22  ;;  %v625_v29 = vadd.f32 %v1409_v47, %v524_v57  ;;  %v627_v20 = vadd.f32 %v1409_v47, %v526_v15 }
 0x121   :  { %703 = vst [vmem:[#allocation7 + $0x110] sm:$0xff] %v605_v37  ;;  %v528_v37 = vmul.f32 %v1399_v13, %v1842_v17 }
 0x122   :  { %704 = vst [vmem:[#allocation7 + $0x118] sm:$0xff] %v606_v43  ;;  %v1843_v43 = vld [vmem:[#allocation31_spill] sm:$0xff]  ;;  %v628_v24 = vadd.f32 %v1409_v47, %v527_v55 }
 0x123   :  { %705 = vst [vmem:[#allocation7 + $0x120] sm:$0xff] %v607_v50  ;;  %v529_v49 = vmul.f32 %v1399_v13, %v1843_v43  ;;  %v1844_v50 = vld [vmem:[#allocation32_spill] sm:$0xff]  ;;  %v629_v28 = vadd.f32 %v1409_v47, %v528_v37 }
 0x124   :  { %706 = vst [vmem:[#allocation7 + $0x128] sm:$0xff] %v608_v58  ;;  %v530_v10 = vmul.f32 %v1399_v13, %v1844_v50  ;;  %v1845_v58 = vld [vmem:[#allocation33_spill] sm:$0xff] }
 0x125   :  { %707 = vst [vmem:[#allocation7 + $0x130] sm:$0xff] %v609_v5  ;;  %v531_v63 = vmul.f32 %v1399_v13, %v1845_v58  ;;  %v1846_v5 = vld [vmem:[#allocation34_spill] sm:$0xff]  ;;  %v630_v32 = vadd.f32 %v1409_v47, %v529_v49 }
 0x126   :  { %708 = vst [vmem:[#allocation7 + $0x138] sm:$0xff] %v610_v11  ;;  %v532_v26 = vmul.f32 %v1399_v13, %v1846_v5  ;;  %v1847_v11 = vld [vmem:[#allocation35_spill] sm:$0xff]  ;;  %v631_v61 = vadd.f32 %v1409_v47, %v530_v10 }
 0x127   :  { %709 = vst [vmem:[#allocation7 + $0x140] sm:$0xff] %v611_v40  ;;  %v533_v36 = vmul.f32 %v1399_v13, %v1847_v11  ;;  %v1848_v40 = vld [vmem:[#allocation36_spill] sm:$0xff]  ;;  %v632_v44 = vadd.f32 %v1409_v47, %v531_v63 }
 0x128   :  { %710 = vst [vmem:[#allocation7 + $0x148] sm:$0xff] %v612_v53  ;;  %v534_v18 = vmul.f32 %v1399_v13, %v1848_v40  ;;  %v1849_v53 = vld [vmem:[#allocation37_spill] sm:$0xff]  ;;  %v633_v42 = vadd.f32 %v1409_v47, %v532_v26 }
 0x129   :  { %711 = vst [vmem:[#allocation7 + $0x150] sm:$0xff] %v613_v52  ;;  %v535_v48 = vmul.f32 %v1399_v13, %v1849_v53  ;;  %v1850_v52 = vld [vmem:[#allocation38_spill] sm:$0xff]  ;;  %v634_v56 = vadd.f32 %v1409_v47, %v533_v36 }
 0x12a   :  { %712 = vst [vmem:[#allocation7 + $0x158] sm:$0xff] %v614_v21  ;;  %v536_v33 = vmul.f32 %v1399_v13, %v1850_v52  ;;  %v1851_v21 = vld [vmem:[#allocation39_spill] sm:$0xff]  ;;  %v635_v23 = vadd.f32 %v1409_v47, %v534_v18 }
 0x12b   :  { %713 = vst [vmem:[#allocation7 + $0x160] sm:$0xff] %v615_v4  ;;  %v537_v60 = vmul.f32 %v1399_v13, %v1851_v21  ;;  %v1852_v4 = vld [vmem:[#allocation40_spill] sm:$0xff]  ;;  %v636_v9 = vadd.f32 %v1409_v47, %v535_v48 }
 0x12c   :  { %714 = vst [vmem:[#allocation7 + $0x168] sm:$0xff] %v616_v27  ;;  %v538_v39 = vmul.f32 %v1399_v13, %v1852_v4  ;;  %v1853_v27 = vld [vmem:[#allocation41_spill] sm:$0xff]  ;;  %v637_v34 = vadd.f32 %v1409_v47, %v536_v33 }
 0x12d   :  { %715 = vst [vmem:[#allocation7 + $0x170] sm:$0xff] %v617_v19  ;;  %v539_v14 = vmul.f32 %v1399_v13, %v1853_v27  ;;  %v1854_v19 = vld [vmem:[#allocation42_spill] sm:$0xff]  ;;  %v638_v25 = vadd.f32 %v1409_v47, %v537_v60 }
 0x12e   :  { %716 = vst [vmem:[#allocation7 + $0x178] sm:$0xff] %v618_v54  ;;  %v540_v31 = vmul.f32 %v1399_v13, %v1854_v19  ;;  %v1855_v54 = vld [vmem:[#allocation43_spill] sm:$0xff]  ;;  %v639_v45 = vadd.f32 %v1409_v47, %v538_v39 }
 0x12f   :  { %717 = vst [vmem:[#allocation7 + $0x180] sm:$0xff] %v619_v35  ;;  %v541_v30 = vmul.f32 %v1399_v13, %v1855_v54  ;;  %v1856_v35 = vld [vmem:[#allocation44_spill] sm:$0xff]  ;;  %v640_v41 = vadd.f32 %v1409_v47, %v539_v14 }
 0x130   :  { %718 = vst [vmem:[#allocation7 + $0x188] sm:$0xff] %v620_v0  ;;  %v542_v59 = vmul.f32 %v1399_v13, %v1856_v35  ;;  %v1857_v0 = vld [vmem:[#allocation45_spill] sm:$0xff]  ;;  %v641_v1 = vadd.f32 %v1409_v47, %v540_v31 }
 0x131   :  { %719 = vst [vmem:[#allocation7 + $0x190] sm:$0xff] %v621_v51  ;;  %v543_v46 = vmul.f32 %v1399_v13, %v1857_v0  ;;  %v1858_v51 = vld [vmem:[#allocation46_spill] sm:$0xff]  ;;  %v642_v57 = vadd.f32 %v1409_v47, %v541_v30 }
 0x132   :  { %720 = vst [vmem:[#allocation7 + $0x198] sm:$0xff] %v622_v6  ;;  %v544_v2 = vmul.f32 %v1399_v13, %v1858_v51  ;;  %v1859_v6 = vld [vmem:[#allocation47_spill] sm:$0xff]  ;;  %v643_v3 = vadd.f32 %v1409_v47, %v542_v59 }
 0x133   :  { %721 = vst [vmem:[#allocation7 + $0x1a0] sm:$0xff] %v623_v7  ;;  %v545_v62 = vmul.f32 %v1399_v13, %v1859_v6  ;;  %v1860_v7 = vld [vmem:[#allocation48_spill] sm:$0xff]  ;;  %v644_v15 = vadd.f32 %v1409_v47, %v543_v46 }
 0x134   :  { %722 = vst [vmem:[#allocation7 + $0x1a8] sm:$0xff] %v624_v12  ;;  %v546_v8 = vmul.f32 %v1399_v13, %v1860_v7  ;;  %v1861_v12 = vld [vmem:[#allocation49_spill] sm:$0xff]  ;;  %v645_v55 = vadd.f32 %v1409_v47, %v544_v2 }
 0x135   :  { %723 = vst [vmem:[#allocation7 + $0x1b0] sm:$0xff] %v625_v29  ;;  %v547_v22 = vmul.f32 %v1399_v13, %v1861_v12  ;;  %v1862_v29 = vld [vmem:[#allocation50_spill] sm:$0xff]  ;;  %v646_v37 = vadd.f32 %v1409_v47, %v545_v62 }
 0x136   :  { %724 = vst [vmem:[#allocation7 + $0x1b8] sm:$0xff] %v626_v16  ;;  %v548_v17 = vmul.f32 %v1399_v13, %v1862_v29  ;;  %v1863_v16 = vld [vmem:[#allocation51_spill] sm:$0xff]  ;;  %v647_v49 = vadd.f32 %v1409_v47, %v546_v8 }
 0x137   :  { %725 = vst [vmem:[#allocation7 + $0x1c0] sm:$0xff] %v627_v20  ;;  %v549_v43 = vmul.f32 %v1399_v13, %v1863_v16  ;;  %v1864_v20 = vld [vmem:[#allocation52_spill] sm:$0xff]  ;;  %v648_v10 = vadd.f32 %v1409_v47, %v547_v22 }
 0x138   :  { %726 = vst [vmem:[#allocation7 + $0x1c8] sm:$0xff] %v628_v24  ;;  %v550_v50 = vmul.f32 %v1399_v13, %v1864_v20  ;;  %v1865_v24 = vld [vmem:[#allocation53_spill] sm:$0xff]  ;;  %v649_v63 = vadd.f32 %v1409_v47, %v548_v17 }
 0x139   :  { %727 = vst [vmem:[#allocation7 + $0x1d0] sm:$0xff] %v629_v28  ;;  %v551_v58 = vmul.f32 %v1399_v13, %v1865_v24  ;;  %v1866_v28 = vld [vmem:[#allocation54_spill] sm:$0xff]  ;;  %v650_v26 = vadd.f32 %v1409_v47, %v549_v43 }
 0x13a   :  { %728 = vst [vmem:[#allocation7 + $0x1d8] sm:$0xff] %v630_v32  ;;  %v552_v5 = vmul.f32 %v1399_v13, %v1866_v28  ;;  %v1867_v32 = vld [vmem:[#allocation55_spill] sm:$0xff]  ;;  %v651_v36 = vadd.f32 %v1409_v47, %v550_v50 }
 0x13b   :  { %729 = vst [vmem:[#allocation7 + $0x1e0] sm:$0xff] %v631_v61  ;;  %v553_v11 = vmul.f32 %v1399_v13, %v1867_v32  ;;  %v1868_v61 = vld [vmem:[#allocation56_spill] sm:$0xff]  ;;  %v652_v18 = vadd.f32 %v1409_v47, %v551_v58 }
 0x13c   :  { %730 = vst [vmem:[#allocation7 + $0x1e8] sm:$0xff] %v632_v44  ;;  %v554_v40 = vmul.f32 %v1399_v13, %v1868_v61  ;;  %v1869_v44 = vld [vmem:[#allocation57_spill] sm:$0xff]  ;;  %v653_v48 = vadd.f32 %v1409_v47, %v552_v5 }
 0x13d   :  { %731 = vst [vmem:[#allocation7 + $0x1f0] sm:$0xff] %v633_v42  ;;  %v555_v53 = vmul.f32 %v1399_v13, %v1869_v44  ;;  %v1870_v42 = vld [vmem:[#allocation58_spill] sm:$0xff]  ;;  %v654_v33 = vadd.f32 %v1409_v47, %v553_v11 }
 0x13e   :  { %732 = vst [vmem:[#allocation7 + $0x1f8] sm:$0xff] %v634_v56  ;;  %v556_v52 = vmul.f32 %v1399_v13, %v1870_v42  ;;  %v1871_v56 = vld [vmem:[#allocation59_spill] sm:$0xff]  ;;  %v655_v60 = vadd.f32 %v1409_v47, %v554_v40 }
 0x13f   :  { %733 = vst [vmem:[#allocation7 + $0x200] sm:$0xff] %v635_v23  ;;  %v557_v21 = vmul.f32 %v1399_v13, %v1871_v56  ;;  %v1872_v23 = vld [vmem:[#allocation60_spill] sm:$0xff]  ;;  %v656_v39 = vadd.f32 %v1409_v47, %v555_v53 }
 0x140   :  { %734 = vst [vmem:[#allocation7 + $0x208] sm:$0xff] %v636_v9  ;;  %v558_v4 = vmul.f32 %v1399_v13, %v1872_v23  ;;  %v1873_v9 = vld [vmem:[#allocation61_spill] sm:$0xff]  ;;  %v657_v14 = vadd.f32 %v1409_v47, %v556_v52 }
 0x141   :  { %735 = vst [vmem:[#allocation7 + $0x210] sm:$0xff] %v637_v34  ;;  %v559_v27 = vmul.f32 %v1399_v13, %v1873_v9  ;;  %v1874_v34 = vld [vmem:[#allocation62_spill] sm:$0xff]  ;;  %v658_v31 = vadd.f32 %v1409_v47, %v557_v21 }
 0x142   :  { %736 = vst [vmem:[#allocation7 + $0x218] sm:$0xff] %v638_v25  ;;  %v560_v19 = vmul.f32 %v1399_v13, %v1874_v34  ;;  %v1875_v25 = vld [vmem:[#allocation63_spill] sm:$0xff]  ;;  %v659_v30 = vadd.f32 %v1409_v47, %v558_v4 }
 0x143   :  { %737 = vst [vmem:[#allocation7 + $0x220] sm:$0xff] %v639_v45  ;;  %v561_v54 = vmul.f32 %v1399_v13, %v1875_v25  ;;  %v1876_v45 = vld [vmem:[#allocation64_spill] sm:$0xff]  ;;  %v660_v59 = vadd.f32 %v1409_v47, %v559_v27 }
 0x144   :  { %738 = vst [vmem:[#allocation7 + $0x228] sm:$0xff] %v640_v41  ;;  %v562_v35 = vmul.f32 %v1399_v13, %v1876_v45  ;;  %v1877_v41 = vld [vmem:[#allocation65_spill] sm:$0xff]  ;;  %v661_v46 = vadd.f32 %v1409_v47, %v560_v19 }
 0x145   :  { %739 = vst [vmem:[#allocation7 + $0x230] sm:$0xff] %v641_v1  ;;  %v563_v0 = vmul.f32 %v1399_v13, %v1877_v41  ;;  %v1878_v1 = vld [vmem:[#allocation66_spill] sm:$0xff]  ;;  %v662_v2 = vadd.f32 %v1409_v47, %v561_v54 }
 0x146   :  { %740 = vst [vmem:[#allocation7 + $0x238] sm:$0xff] %v642_v57  ;;  %v564_v51 = vmul.f32 %v1399_v13, %v1878_v1  ;;  %v1879_v57 = vld [vmem:[#allocation67_spill] sm:$0xff]  ;;  %v663_v62 = vadd.f32 %v1409_v47, %v562_v35 }
 0x147   :  { %741 = vst [vmem:[#allocation7 + $0x240] sm:$0xff] %v643_v3  ;;  %v565_v6 = vmul.f32 %v1399_v13, %v1879_v57  ;;  %v1880_v3 = vld [vmem:[#allocation68_spill] sm:$0xff]  ;;  %v664_v8 = vadd.f32 %v1409_v47, %v563_v0 }
 0x148   :  { %742 = vst [vmem:[#allocation7 + $0x248] sm:$0xff] %v644_v15  ;;  %v566_v7 = vmul.f32 %v1399_v13, %v1880_v3  ;;  %v567_v15 = vmul.f32 %v1399_v13, %v1387_v38  ;;  %v665_v12 = vadd.f32 %v1409_v47, %v564_v51 }
 0x149   :  { %743 = vst [vmem:[#allocation7 + $0x250] sm:$0xff] %v645_v55  ;;  %v666_v22 = vadd.f32 %v1409_v47, %v565_v6 }
 0x14a   :  { %744 = vst [vmem:[#allocation7 + $0x258] sm:$0xff] %v646_v37  ;;  %v667_v55 = vadd.f32 %v1409_v47, %v566_v7  ;;  %v668_v29 = vadd.f32 %v1409_v47, %v567_v15 }
 0x14b   :  { %745 = vst [vmem:[#allocation7 + $0x260] sm:$0xff] %v647_v49 }
 0x14c   :  { %746 = vst [vmem:[#allocation7 + $0x268] sm:$0xff] %v648_v10 }
 0x14d   :  { %747 = vst [vmem:[#allocation7 + $0x270] sm:$0xff] %v649_v63 }
 0x14e   :  { %748 = vst [vmem:[#allocation7 + $0x278] sm:$0xff] %v650_v26 }
 0x14f   :  { %749 = vst [vmem:[#allocation7 + $0x280] sm:$0xff] %v651_v36 }
 0x150   :  { %750 = vst [vmem:[#allocation7 + $0x288] sm:$0xff] %v652_v18 }
 0x151   :  { %751 = vst [vmem:[#allocation7 + $0x290] sm:$0xff] %v653_v48 }
 0x152   :  { %752 = vst [vmem:[#allocation7 + $0x298] sm:$0xff] %v654_v33 }
 0x153   :  { %753 = vst [vmem:[#allocation7 + $0x2a0] sm:$0xff] %v655_v60 }
 0x154   :  { %754 = vst [vmem:[#allocation7 + $0x2a8] sm:$0xff] %v656_v39 }
 0x155   :  { %755 = vst [vmem:[#allocation7 + $0x2b0] sm:$0xff] %v657_v14 }
 0x156   :  { %756 = vst [vmem:[#allocation7 + $0x2b8] sm:$0xff] %v658_v31 }
 0x157   :  { %757 = vst [vmem:[#allocation7 + $0x2c0] sm:$0xff] %v659_v30 }
 0x158   :  { %758 = vst [vmem:[#allocation7 + $0x2c8] sm:$0xff] %v660_v59 }
 0x159   :  { %759 = vst [vmem:[#allocation7 + $0x2d0] sm:$0xff] %v661_v46 }
 0x15a   :  { %760 = vst [vmem:[#allocation7 + $0x2d8] sm:$0xff] %v662_v2 }
 0x15b   :  { %761 = vst [vmem:[#allocation7 + $0x2e0] sm:$0xff] %v663_v62 }
 0x15c   :  { %762 = vst [vmem:[#allocation7 + $0x2e8] sm:$0xff] %v664_v8 }
 0x15d   :  { %763 = vst [vmem:[#allocation7 + $0x2f0] sm:$0xff] %v665_v12 }
 0x15e   :  { %764 = vst [vmem:[#allocation7 + $0x2f8] sm:$0xff] %v666_v22 }
 0x15f   :  { %765 = vst [vmem:[#allocation7 + $0x300] sm:$0xff] %v667_v55 }
 0x160   :  { %766 = vst [vmem:[#allocation7 + $0x308] sm:$0xff] %v668_v29 }
 0x161   :  { %779 = dma.vmem_to_hbm [thread:$0]  %s772_s24, 12544, %s774_s27, [#allocation4], %s873_s20, %s873_s20, %s874_s21  }
 0x162   :  { %870 = dma.done.wait [#allocation4], 12544  }
 0x163   :  { %871 = vsyncadd [#allocation4], 4294954752 }
 0x164   :  { %784 = vsyncpa [#allocation3], 1 }
 0x165   :  { %785 = vsyncpa [#allocation6], 1 }
 0x166   :  { %786 = vsyncpa [#allocation4], 1 }

</bundles_post_ra>
